<compile_context>
chip_gen: v7x
topology: tpu7x:2x2x1
jax: 0.10.0
libtpu: 0.0.40
codegen_flags: <defaults>
</compile_context>

<pallas_src>
import functools

import jax
import jax.numpy as jnp
from jax.experimental import pallas as pl
from jax.experimental.pallas import tpu as pltpu


def _round_up(x, m):
    return (x + m - 1) // m * m


def _dqn_kernel(x_ref, w1_ref, b1_ref, w2_ref, b2_ref, w3_ref, b3_ref, o_ref):
    # Shapes (feature-major, batch on lanes):
    #   x:  (state_dim, TILE_B)    w1: (32, state_dim)   b1: (32, 1)
    #   h1: (32, TILE_B)           w2: (32, 32)          b2: (32, 1)
    #   h2: (32, TILE_B)           w3: (action_dim, 32)  b3: (action_dim, 1)
    #   o:  (action_dim, TILE_B)   -> lane-dense, unmasked stores
    x = x_ref[...]
    h1 = jnp.dot(w1_ref[...], x, preferred_element_type=jnp.float32)
    h1 = jnp.maximum(h1 + b1_ref[...], 0.0)
    h2 = jnp.dot(w2_ref[...], h1, preferred_element_type=jnp.float32)
    h2 = jnp.maximum(h2 + b2_ref[...], 0.0)
    q = jnp.dot(w3_ref[...], h2, preferred_element_type=jnp.float32)
    o_ref[...] = (q + b3_ref[...]).astype(o_ref.dtype)


@functools.partial(jax.jit, static_argnames=("tile_b",))
def dqn_forward(state, params, tile_b=1024):
    """state: (B, state_dim) f32.  params: PyTorch-native shapes
    w: (out, in), b: (out, 1).  Returns (B, action_dim) f32."""
    w1, b1, w2, b2, w3, b3 = (params["w1"], params["b1"], params["w2"],
                              params["b2"], params["w3"], params["b3"])
    B, state_dim = state.shape
    hidden = w1.shape[0]
    action_dim = w3.shape[0]

    # Batch tile: multiple of 128 (lane width).  Capped so small batches don't
    # over-pad; at tile_b=1024 the per-step VMEM footprint is ~0.4 MiB, far
    # below the 32 MiB scoped limit on every generation (incl. v7x's 64 MiB).
    tile_b = min(tile_b, _round_up(B, 128))
    b_pad = _round_up(B, tile_b)
    grid = (b_pad // tile_b,)

    # Feature-major input slab, zero-padded batch (padded columns are sliced
    # off after the call).  This wrapper transpose is pure layout plumbing.
    x_t = jnp.pad(state.T, ((0, 0), (0, b_pad - B)))

    # Full-array blocks with a constant index_map -> VMEM-resident, no re-DMA.
    resident = lambda a: pl.BlockSpec(a.shape, lambda i: (0, 0))

    flops = 2 * B * (state_dim * hidden + hidden * hidden + hidden * action_dim)
    bytes_accessed = 4 * (B * (state_dim + action_dim)
                          + w1.size + b1.size + w2.size + b2.size
                          + w3.size + b3.size)
    cost = pl.CostEstimate(flops=flops, transcendentals=0,
                           bytes_accessed=bytes_accessed)

    out_t = pl.pallas_call(
        _dqn_kernel,
        out_shape=jax.ShapeDtypeStruct((action_dim, b_pad), jnp.float32),
        grid=grid,
        in_specs=[pl.BlockSpec((state_dim, tile_b), lambda i: (0, i)),
                  resident(w1), resident(b1),
                  resident(w2), resident(b2),
                  resident(w3), resident(b3)],
        out_specs=pl.BlockSpec((action_dim, tile_b), lambda i: (0, i)),
        compiler_params=pltpu.CompilerParams(
            dimension_semantics=("parallel",),          # 2 TCs on v7x
            vmem_limit_bytes=32 * 1024 * 1024),
        cost_estimate=cost,
    )(x_t, w1, b1, w2, b2, w3, b3)

    return out_t[:, :B].T


def init_dqn_params(key, state_dim, action_dim, hidden=32):
    """PyTorch nn.Linear default init (U[-1/sqrt(fan_in), 1/sqrt(fan_in)]),
    stored PyTorch-native: w (out, in), b (out, 1)."""
    def linear(k, fan_in, fan_out):
        kw, kb = jax.random.split(k)
        bound = 1.0 / jnp.sqrt(fan_in)
        w = jax.random.uniform(kw, (fan_out, fan_in), jnp.float32, -bound, bound)
        b = jax.random.uniform(kb, (fan_out, 1), jnp.float32, -bound, bound)
        return w, b

    k1, k2, k3 = jax.random.split(key, 3)
    w1, b1 = linear(k1, state_dim, hidden)
    w2, b2 = linear(k2, hidden, hidden)
    w3, b3 = linear(k3, hidden, action_dim)
    return {"w1": w1, "b1": b1, "w2": w2, "b2": b2, "w3": w3, "b3": b3}


def dqn_reference(state, params):
    """Pure-JAX reference for correctness checking (batch-major math)."""
    h = jnp.maximum(state @ params["w1"].T + params["b1"].T, 0.0)
    h = jnp.maximum(h @ params["w2"].T + params["b2"].T, 0.0)
    return h @ params["w3"].T + params["b3"].T


if __name__ == "__main__":
    key = jax.random.PRNGKey(0)
    k_params, k_state1, k_state2 = jax.random.split(key, 3)

    state_dim, action_dim = 8, 4
    params = init_dqn_params(k_params, state_dim, action_dim)

    # Small shape consistent with the module (toy replay-buffer minibatch).
    batch = 2
    state = jax.random.normal(k_state1, (batch, state_dim), jnp.float32)
    q = dqn_forward(state, params)
    jax.block_until_ready(q)
    q_ref = dqn_reference(state, params)
    assert q.shape == (batch, action_dim)
    assert jnp.allclose(q, q_ref, atol=1e-4, rtol=1e-4)

    # Also exercise the multi-tile grid path (padding + resident weights).
    batch2 = 300
    state2 = jax.random.normal(k_state2, (batch2, state_dim), jnp.float32)
    q2 = dqn_forward(state2, params, tile_b=128)   # grid = (3,), padded to 384
    jax.block_until_ready(q2)
    q2_ref = dqn_reference(state2, params)
    assert q2.shape == (batch2, action_dim)
    assert jnp.allclose(q2, q2_ref, atol=1e-4, rtol=1e-4)

    print("KERNEL_OK")
</pallas_src>

<mosaic_0001>
module attributes {stable_mosaic.version = 11 : i64} {
  func.func @_dqn_kernel(%arg0: i32, %arg1: memref<8x128xf32, #tpu.memory_space<vmem>>, %arg2: memref<32x8xf32, #tpu.memory_space<vmem>>, %arg3: memref<32x1xf32, #tpu.memory_space<vmem>>, %arg4: memref<32x32xf32, #tpu.memory_space<vmem>>, %arg5: memref<32x1xf32, #tpu.memory_space<vmem>>, %arg6: memref<4x32xf32, #tpu.memory_space<vmem>>, %arg7: memref<4x1xf32, #tpu.memory_space<vmem>>, %arg8: memref<4x128xf32, #tpu.memory_space<vmem>>) attributes {dimension_semantics = [#tpu.dimension_semantics<parallel>], iteration_bounds = array<i64: 1>, scalar_prefetch = 0 : i64, scratch_operands = 0 : i64, tpu.core_type = #tpu.core_type<tc>, window_params = [{transform_indices = @transform_0, window_bounds = array<i64: 8, 128>}, {pipeline_mode = #tpu.pipeline_mode<synchronous>, transform_indices = @transform_1, window_bounds = array<i64: 32, 8>}, {pipeline_mode = #tpu.pipeline_mode<synchronous>, transform_indices = @transform_2, window_bounds = array<i64: 32, 1>}, {pipeline_mode = #tpu.pipeline_mode<synchronous>, transform_indices = @transform_3, window_bounds = array<i64: 32, 32>}, {pipeline_mode = #tpu.pipeline_mode<synchronous>, transform_indices = @transform_4, window_bounds = array<i64: 32, 1>}, {pipeline_mode = #tpu.pipeline_mode<synchronous>, transform_indices = @transform_5, window_bounds = array<i64: 4, 32>}, {pipeline_mode = #tpu.pipeline_mode<synchronous>, transform_indices = @transform_6, window_bounds = array<i64: 4, 1>}, {transform_indices = @transform_7, window_bounds = array<i64: 4, 128>}]} {
    %c0 = arith.constant 0 : index
    %c0_0 = arith.constant 0 : index
    %0 = vector.load %arg1[%c0, %c0_0] : memref<8x128xf32, #tpu.memory_space<vmem>>, vector<8x128xf32>
    %c0_1 = arith.constant 0 : index
    %c0_2 = arith.constant 0 : index
    %1 = vector.load %arg2[%c0_1, %c0_2] : memref<32x8xf32, #tpu.memory_space<vmem>>, vector<32x8xf32>
    %cst = arith.constant dense<0.000000e+00> : vector<32x128xf32>
    %2 = tpu.matmul %1, %0, %cst {dimension_numbers = #tpu.dot_dimension_numbers<[1], [0], [0], [1], [0, 0, 1, 1], [], []>} : vector<32x8xf32>, vector<8x128xf32>, vector<32x128xf32> -> vector<32x128xf32>
    %c0_3 = arith.constant 0 : index
    %c0_4 = arith.constant 0 : index
    %3 = vector.load %arg3[%c0_3, %c0_4] : memref<32x1xf32, #tpu.memory_space<vmem>>, vector<32x1xf32>
    %4 = vector.broadcast %3 : vector<32x1xf32> to vector<32x128xf32>
    %5 = arith.addf %2, %4 : vector<32x128xf32>
    %cst_5 = arith.constant 0.000000e+00 : f32
    %6 = vector.broadcast %cst_5 : f32 to vector<32x128xf32>
    %7 = arith.maximumf %5, %6 : vector<32x128xf32>
    %c0_6 = arith.constant 0 : index
    %c0_7 = arith.constant 0 : index
    %8 = vector.load %arg4[%c0_6, %c0_7] : memref<32x32xf32, #tpu.memory_space<vmem>>, vector<32x32xf32>
    %cst_8 = arith.constant dense<0.000000e+00> : vector<32x128xf32>
    %9 = tpu.matmul %8, %7, %cst_8 {dimension_numbers = #tpu.dot_dimension_numbers<[1], [0], [0], [1], [0, 0, 1, 1], [], []>} : vector<32x32xf32>, vector<32x128xf32>, vector<32x128xf32> -> vector<32x128xf32>
    %c0_9 = arith.constant 0 : index
    %c0_10 = arith.constant 0 : index
    %10 = vector.load %arg5[%c0_9, %c0_10] : memref<32x1xf32, #tpu.memory_space<vmem>>, vector<32x1xf32>
    %11 = vector.broadcast %10 : vector<32x1xf32> to vector<32x128xf32>
    %12 = arith.addf %9, %11 : vector<32x128xf32>
    %cst_11 = arith.constant 0.000000e+00 : f32
    %13 = vector.broadcast %cst_11 : f32 to vector<32x128xf32>
    %14 = arith.maximumf %12, %13 : vector<32x128xf32>
    %c0_12 = arith.constant 0 : index
    %c0_13 = arith.constant 0 : index
    %15 = vector.load %arg6[%c0_12, %c0_13] : memref<4x32xf32, #tpu.memory_space<vmem>>, vector<4x32xf32>
    %cst_14 = arith.constant dense<0.000000e+00> : vector<4x128xf32>
    %16 = tpu.matmul %15, %14, %cst_14 {dimension_numbers = #tpu.dot_dimension_numbers<[1], [0], [0], [1], [0, 0, 1, 1], [], []>} : vector<4x32xf32>, vector<32x128xf32>, vector<4x128xf32> -> vector<4x128xf32>
    %c0_15 = arith.constant 0 : index
    %c0_16 = arith.constant 0 : index
    %17 = vector.load %arg7[%c0_15, %c0_16] : memref<4x1xf32, #tpu.memory_space<vmem>>, vector<4x1xf32>
    %18 = vector.broadcast %17 : vector<4x1xf32> to vector<4x128xf32>
    %19 = arith.addf %16, %18 : vector<4x128xf32>
    %c0_17 = arith.constant 0 : index
    %c0_18 = arith.constant 0 : index
    %20 = vector.load %arg8[%c0_17, %c0_18] : memref<4x128xf32, #tpu.memory_space<vmem>>, vector<4x128xf32>
    tpu.vector_store %arg8[%c0_17, %c0_18], %19 {strides = array<i32>} : memref<4x128xf32, #tpu.memory_space<vmem>>, vector<4x128xf32>,
    return
  }
  func.func @transform_0(%arg0: i32) -> (i32, i32) {
    %c0_i32 = arith.constant 0 : i32
    %c0_i32_0 = arith.constant 0 : i32
    return %c0_i32, %arg0 : i32, i32
  }
  func.func @transform_1(%arg0: i32) -> (i32, i32) {
    %c0_i32 = arith.constant 0 : i32
    %c0_i32_0 = arith.constant 0 : i32
    %c0_i32_1 = arith.constant 0 : i32
    return %c0_i32, %c0_i32_0 : i32, i32
  }
  func.func @transform_2(%arg0: i32) -> (i32, i32) {
    %c0_i32 = arith.constant 0 : i32
    %c0_i32_0 = arith.constant 0 : i32
    %c0_i32_1 = arith.constant 0 : i32
    return %c0_i32, %c0_i32_0 : i32, i32
  }
  func.func @transform_3(%arg0: i32) -> (i32, i32) {
    %c0_i32 = arith.constant 0 : i32
    %c0_i32_0 = arith.constant 0 : i32
    %c0_i32_1 = arith.constant 0 : i32
    return %c0_i32, %c0_i32_0 : i32, i32
  }
  func.func @transform_4(%arg0: i32) -> (i32, i32) {
    %c0_i32 = arith.constant 0 : i32
    %c0_i32_0 = arith.constant 0 : i32
    %c0_i32_1 = arith.constant 0 : i32
    return %c0_i32, %c0_i32_0 : i32, i32
  }
  func.func @transform_5(%arg0: i32) -> (i32, i32) {
    %c0_i32 = arith.constant 0 : i32
    %c0_i32_0 = arith.constant 0 : i32
    %c0_i32_1 = arith.constant 0 : i32
    return %c0_i32, %c0_i32_0 : i32, i32
  }
  func.func @transform_6(%arg0: i32) -> (i32, i32) {
    %c0_i32 = arith.constant 0 : i32
    %c0_i32_0 = arith.constant 0 : i32
    %c0_i32_1 = arith.constant 0 : i32
    return %c0_i32, %c0_i32_0 : i32, i32
  }
  func.func @transform_7(%arg0: i32) -> (i32, i32) {
    %c0_i32 = arith.constant 0 : i32
    %c0_i32_0 = arith.constant 0 : i32
    return %c0_i32, %arg0 : i32, i32
  }
}

</mosaic_0001>

<bundles_post_ra>
// kernel: dqn_forward.1
= control target key start
LH: loop header
LB: loop body
LE: loop exit
PB: predicated region body
PF: predicated region fallthrough
CT: control target
= control target key end

     0   :  { %vm55_vm0 = vcmask 64512   ;;  %v452_v3 = vmov 0   ;;  %vm185_vm1 = vcmask 261120   ;;  %v453_v37 = vmov 0.0|0.0   ;;  %s565_s0 = inlined_call_operand.vmem [shape: f32[8,128], index: 0, kind: input, shape index: {}]   ;;  %s566_s1 = inlined_call_operand.vmem [shape: f32[32,8], index: 1, kind: input, shape index: {}]   ;;  %s567_s2 = inlined_call_operand.vmem [shape: f32[32,1], index: 2, kind: input, shape index: {}]   ;;  %s568_s4 = inlined_call_operand.vmem [shape: f32[32,1], index: 4, kind: input, shape index: {}]   ;;  %s569_s6 = inlined_call_operand.vmem [shape: f32[4,1], index: 6, kind: input, shape index: {}]   ;;  %s570_s3 = inlined_call_operand.vmem [shape: f32[32,32], index: 3, kind: input, shape index: {}]   ;;  %s571_s5 = inlined_call_operand.vmem [shape: f32[4,32], index: 5, kind: input, shape index: {}]   ;;  %s572_s7 = inlined_call_operand.vmem [shape: f32[4,128], index: 7, kind: output, shape index: {}]  }
   0x1   :  { %v26_v0 = vld [vmem:[%s565_s0] sm:$0xff]  ;;  %v28_v2 = vld [vmem:[%s566_s1 + $0x8] sm:$0xff]  ;;  %450 = vset.pattern.permute.xlu0 %v452_v3  ;;  %451 = vset.pattern.permute.xlu1 %v452_v3  ;;  %v29_v4 = vld [vmem:[%s566_s1 + $0x10] sm:$0xff]  ;;  %vm454_vm2 = vmmov 0   ;;  %v455_v38 = vmov 0.0  }
   0x2   :  { %v27_v1 = vld [vmem:[%s566_s1] sm:$0xff]  ;;  %399 = vmatprep.subr.mxu0 %v26_v0  ;;  %v33_v6 = vld [vmem:[%s567_s2 + $0x10] sm:$0xff]  ;;  %v32_v7 = vld [vmem:[%s567_s2 + $0x8] sm:$0xff] }
   0x3   :  { %401 = vmatprep.mubr.msk.f32.mxu0 %vm55_vm0, %v27_v1  ;;  %v31_v5 = vld [vmem:[%s567_s2] sm:$0xff]  ;;  %400 = vmatpush3.msra.mxu0 %v26_v0  ;;  %v30_v8 = vld [vmem:[%s566_s1 + $0x18] sm:$0xff]  ;;  %v162_v11 = vld [vmem:[%s568_s4 + $0x8] sm:$0xff] }
   0x4   :  { %37 = vperm.xlu0 %450, %v31_v5   ;;  %402 = vmatmul.mubr.msk.f32.vlgmr.msra.gmra.mrb[0].mxu0 %vm55_vm0, %v28_v2  ;;  %v34_v9 = vld [vmem:[%s567_s2 + $0x18] sm:$0xff]  ;;  %v161_v10 = vld [vmem:[%s568_s4] sm:$0xff]  ;;  %v163_v12 = vld [vmem:[%s568_s4 + $0x10] sm:$0xff] }
   0x5   :  { %47 = vperm.xlu1 %451, %v33_v6   ;;  %404 = vmatprep.mubr.msk.f32.mxu0 %vm55_vm0, %v29_v4  ;;  %v164_v13 = vld [vmem:[%s568_s4 + $0x18] sm:$0xff]  ;;  %v288_v14 = vld [vmem:[%s569_s6] sm:$0xf]  ;;  %v158_v34 = vld [vmem:[%s570_s3 + $0x8] sm:$0xff] }
   0x6   :  { %v157_v15 = vld [vmem:[%s570_s3] sm:$0xff]  ;;  %v159_v35 = vld [vmem:[%s570_s3 + $0x10] sm:$0xff]  ;;  %v160_v36 = vld [vmem:[%s570_s3 + $0x18] sm:$0xff]  ;;  %440 = vmatprep.subr.bf16.mxu0 %v453_v37 }
   0x7   :  { %415 = vmatprep.mubr.msk.f32.mxu1 %vm185_vm1, %v157_v15  ;;  %v287_v57 = vld [vmem:[%s571_s5] sm:$0xf] }
   0x8   :  { %42 = vperm.xlu0 %450, %v32_v7   ;;  %405 = vmatmul.mubr.msk.f32.gmra.mrb[2].mxu0 %vm55_vm0, %v30_v8 }
   0x9   :  { %52 = vperm.xlu1 %451, %v34_v9   ;;  %429 = vmatprep.mubr.msk.f32.mxu0 %vm454_vm2, %v455_v38 }
   0xc   :  { %167 = vperm.xlu0 %450, %v161_v10  }
   0xd   :  { %172 = vperm.xlu1 %451, %v162_v11  }
  0x10   :  { %177 = vperm.xlu0 %450, %v163_v12  }
  0x11   :  { %182 = vperm.xlu1 %451, %v164_v13  }
  0x14   :  { %291 = vperm.xlu0 %450, %v288_v14  }
  0x83   :  { %v38_v16 = vpop.permute.xlu0 %37 }
  0x84   :  { %v48_v17 = vpop.permute.xlu1 %47 }
  0x87   :  { %v43_v18 = vpop.permute.xlu0 %42 }
  0x88   :  { %v53_v24 = vpop.permute.xlu1 %52 }
  0x8b   :  { %v168_v40 = vpop.permute.xlu0 %167 }
  0x8c   :  { %v173_v39 = vpop.permute.xlu1 %172 }
  0x8f   :  { %v178_v49 = vpop.permute.xlu0 %177 }
  0x90   :  { %v183_v46 = vpop.permute.xlu1 %182 }
  0x93   :  { %v292_v58 = vpop.permute.xlu0 %291 }
  0xd7   :  { %v403_v19 = vpop.f32.mrb[0].mxu0 }
  0xd8   :  { %v140_v20 = vadd.f32 %v403_v19, %v43_v18  ;;  %v134_v21 = vpop.f32.mrb[1].mxu0 }
  0xd9   :  { %v135_v22 = vadd.f32 %v134_v21, %v38_v16 }
  0xda   :  { %v154_v23 = vmax.f32 %v140_v20, 0.0 }
  0xdb   :  { %v153_v25 = vmax.f32 %v135_v22, 0.0  ;;  %v406_v26 = vpop.f32.mrb[2].mxu0 }
  0xdc   :  { %v150_v27 = vadd.f32 %v406_v26, %v53_v24  ;;  %v144_v28 = vpop.f32.mrb[3].mxu0 }
  0xdd   :  { %v145_v29 = vadd.f32 %v144_v28, %v48_v17  ;;  %v432_v30 = vpack.c.bf16 %v154_v23, %v153_v25 }
  0xde   :  { %v156_v31 = vmax.f32 %v150_v27, 0.0 }
  0xdf   :  { %v155_v32 = vmax.f32 %v145_v29, 0.0  ;;  %433 = vmatprep.subr.bf16.mxu1 %v432_v30 }
  0xe0   :  { %435 = vmatpush3.bf16.msra.mxu1 %v432_v30 }
  0xe1   :  { %v436_v33 = vpack.c.bf16 %v156_v31, %v155_v32 }
  0xe3   :  { %437 = vmatprep.subr.bf16.mxu1 %v436_v33 }
  0xe4   :  { %439 = vmatpush3.bf16.msra.mxu1 %v436_v33 }
  0xe7   :  { %416 = vmatmul.mubr.msk.f32.vlgmr.msra.gmra.mrb[0].mxu1 %vm185_vm1, %v158_v34 }
  0xe8   :  { %418 = vmatprep.mubr.msk.f32.mxu1 %vm185_vm1, %v159_v35 }
  0xeb   :  { %419 = vmatmul.mubr.msk.f32.gmra.mrb[2].mxu1 %vm185_vm1, %v160_v36 }
 0x1ba   :  { %v417_v41 = vpop.f32.mrb[0].mxu1 }
 0x1bb   :  { %v270_v42 = vadd.f32 %v417_v41, %v173_v39  ;;  %v264_v43 = vpop.f32.mrb[1].mxu1 }
 0x1bc   :  { %v265_v44 = vadd.f32 %v264_v43, %v168_v40 }
 0x1bd   :  { %v284_v45 = vmax.f32 %v270_v42, 0.0 }
 0x1be   :  { %v283_v47 = vmax.f32 %v265_v44, 0.0  ;;  %v420_v48 = vpop.f32.mrb[2].mxu1 }
 0x1bf   :  { %v280_v50 = vadd.f32 %v420_v48, %v183_v46  ;;  %v274_v51 = vpop.f32.mrb[3].mxu1 }
 0x1c0   :  { %v441_v52 = vpack.c.bf16 %v284_v45, %v283_v47  ;;  %v275_v53 = vadd.f32 %v274_v51, %v178_v49 }
 0x1c1   :  { %v286_v54 = vmax.f32 %v280_v50, 0.0 }
 0x1c2   :  { %v285_v55 = vmax.f32 %v275_v53, 0.0  ;;  %442 = vmatpush3.bf16.msra.mxu0 %v441_v52 }
 0x1c3   :  { %443 = vmatprep.subr.bf16.mxu0 %v453_v37 }
 0x1c4   :  { %v444_v56 = vpack.c.bf16 %v286_v54, %v285_v55 }
 0x1c6   :  { %445 = vmatpush3.bf16.msra.mxu0 %v444_v56 }
 0x1c9   :  { %430 = vmatmul.mubr.msk.f32.vlgmr.msra.gmra.mrb[4].mxu0 %vm185_vm1, %v287_v57 }
 0x29c   :  { %v363_v59 = vpop.f32.mrb[4].mxu0 }
 0x29d   :  { %v364_v60 = vadd.f32 %v363_v59, %v292_v58  ;;  %v431_v61 = vpop.f32.mrb[5].mxu0 }
 0x29f   :  { %367 = vst [vmem:[%s572_s7] sm:$0xf] %v364_v60 }

</bundles_post_ra>
